<compile_context>
chip_gen: v7x
topology: tpu7x:2x2x1
jax: 0.10.0
libtpu: 0.0.40
codegen_flags: <defaults>
</compile_context>

<pallas_src>
import functools
import math

import jax
import jax.numpy as jnp
from jax import lax
from jax.experimental import pallas as pl
from jax.experimental.pallas import tpu as pltpu


_BN_EPS = 1e-5


def _round_up(x, m):
    return (x + m - 1) // m * m


@functools.lru_cache(maxsize=None)
def _vmem_limit_bytes():
    """Scoped-VMEM limit sized per TPU generation (v7x: 64 MiB, v5e/v6e: 128 MiB)."""
    cap = 64 * 1024 * 1024
    try:
        info = pltpu.get_tpu_info()
        cap = int(getattr(info, "vmem_capacity_bytes", cap))
    except Exception:
        pass
    return max(32 * 1024 * 1024, cap - 16 * 1024 * 1024)


def _choose_tile_m(m, k, cpad):
    """Largest row tile (multiple of 8 dividing m) whose working set fits VMEM.

    Budget: double-buffered bf16 (tm, K) patches + double-buffered bf16 (tm, Cpad)
    output + resident (double-buffered) bf16 (K, Cpad) weight + f32 stats.
    """
    if m <= 8:
        return m
    budget = (3 * _vmem_limit_bytes()) // 4
    fixed = 4 * k * cpad + 64 * cpad           # weight (x2 buffers) + stats block
    per_row = 4 * k + 4 * cpad                 # patches + y, both bf16, double-buffered
    tmax = (budget - fixed) // per_row if budget > fixed else 8
    tmax = int(min(max(tmax, 8), 1024, m))
    t = tmax - (tmax % 8)
    while t >= 8:
        if m % t == 0:
            return t
        t -= 8
    return m


# ----------------------------------------------------------------------------
# Pallas kernels
# ----------------------------------------------------------------------------
def _conv_stats_kernel(p_ref, w_ref, y_ref, s_ref):
    """y = patches @ W on the MXU (bf16 in, f32 acc), stored bf16, plus per-tile
    per-channel [sum; sum_sq] partials written as one dense (2, Cpad) f32 block."""
    y = jnp.dot(p_ref[...], w_ref[...], preferred_element_type=jnp.float32)
    y_ref[...] = y.astype(y_ref.dtype)
    s_ref[...] = jnp.concatenate(
        [jnp.sum(y, axis=0, keepdims=True),
         jnp.sum(y * y, axis=0, keepdims=True)], axis=0)


def _bn_relu_kernel(s_ref, y_ref, o_ref, *, inv_m):
    """BatchNorm (batch stats, gamma=1, beta=0, eps=1e-5) + ReLU; bf16 in/out."""
    mean = s_ref[0:1, :] * inv_m
    var = jnp.maximum(s_ref[1:2, :] * inv_m - mean * mean, 0.0)   # clamp cancellation
    scale = lax.rsqrt(var + _BN_EPS)
    y = y_ref[...].astype(jnp.float32)
    o_ref[...] = jnp.maximum((y - mean) * scale, 0.0).astype(o_ref.dtype)


def _head_kernel(p_ref, w_ref, b_ref, eps_ref, z_ref, mu_ref, lv_ref, *, npad):
    """[mu | logvar] in one matmul, then z = mu + exp(logvar/2) * eps."""
    y = jnp.dot(p_ref[...], w_ref[...], preferred_element_type=jnp.float32) + b_ref[...]
    mu = y[:, :npad]
    lv = y[:, npad:]
    z_ref[...] = mu + jnp.exp(lv * 0.5) * eps_ref[...]
    mu_ref[...] = mu
    lv_ref[...] = lv


# ----------------------------------------------------------------------------
# pallas_call wrappers (M-tiled grids, "parallel" M axis)
# ----------------------------------------------------------------------------
def conv_bn_relu(patches, w_mat):
    """patches [M, K] bf16, w_mat [K, Cpad] bf16 -> relu(batchnorm(conv)) [M, Cpad] bf16."""
    M, K = patches.shape
    Cpad = w_mat.shape[1]
    tm = _choose_tile_m(M, K, Cpad)
    nt = M // tm
    grid = (nt,)
    vmem = _vmem_limit_bytes()

    y, partial = pl.pallas_call(
        _conv_stats_kernel,
        grid=grid,
        in_specs=[pl.BlockSpec((tm, K), lambda i: (i, 0)),
                  pl.BlockSpec((K, Cpad), lambda i: (0, 0))],
        out_specs=(pl.BlockSpec((tm, Cpad), lambda i: (i, 0)),
                   pl.BlockSpec((None, 2, Cpad), lambda i: (i, 0, 0))),
        out_shape=(jax.ShapeDtypeStruct((M, Cpad), jnp.bfloat16),
                   jax.ShapeDtypeStruct((nt, 2, Cpad), jnp.float32)),
        compiler_params=pltpu.CompilerParams(
            dimension_semantics=("parallel",),      # per-tile partial stats -> safe
            vmem_limit_bytes=vmem),
        cost_estimate=pl.CostEstimate(
            flops=2 * M * K * Cpad,
            transcendentals=0,
            bytes_accessed=2 * M * K + 2 * K * Cpad + 2 * M * Cpad + 8 * nt * Cpad),
    )(patches, w_mat)

    stats = jnp.sum(partial, axis=0)                # tiny [2, Cpad] reduce in XLA

    out = pl.pallas_call(
        functools.partial(_bn_relu_kernel, inv_m=1.0 / M),
        grid=grid,
        in_specs=[pl.BlockSpec((2, Cpad), lambda i: (0, 0)),
                  pl.BlockSpec((tm, Cpad), lambda i: (i, 0))],
        out_specs=pl.BlockSpec((tm, Cpad), lambda i: (i, 0)),
        out_shape=jax.ShapeDtypeStruct((M, Cpad), jnp.bfloat16),
        compiler_params=pltpu.CompilerParams(
            dimension_semantics=("parallel",),
            vmem_limit_bytes=vmem),
        cost_estimate=pl.CostEstimate(
            flops=4 * M * Cpad, transcendentals=nt * Cpad,
            bytes_accessed=4 * M * Cpad + 8 * Cpad),
    )(stats, y)
    return out


def head(patches, w_cat, b_cat, eps, npad):
    """patches [M, K] bf16, w_cat [K, 2*npad] bf16 -> (z, mu, logvar), each [M, npad] f32."""
    M, K = patches.shape
    tm = _choose_tile_m(M, K, 2 * npad)
    grid = (M // tm,)
    sds = jax.ShapeDtypeStruct((M, npad), jnp.float32)
    return pl.pallas_call(
        functools.partial(_head_kernel, npad=npad),
        grid=grid,
        in_specs=[pl.BlockSpec((tm, K), lambda i: (i, 0)),
                  pl.BlockSpec((K, 2 * npad), lambda i: (0, 0)),
                  pl.BlockSpec((1, 2 * npad), lambda i: (0, 0)),
                  pl.BlockSpec((tm, npad), lambda i: (i, 0))],
        out_specs=(pl.BlockSpec((tm, npad), lambda i: (i, 0)),
                   pl.BlockSpec((tm, npad), lambda i: (i, 0)),
                   pl.BlockSpec((tm, npad), lambda i: (i, 0))),
        out_shape=(sds, sds, sds),
        compiler_params=pltpu.CompilerParams(
            dimension_semantics=("parallel",),
            vmem_limit_bytes=_vmem_limit_bytes()),
        cost_estimate=pl.CostEstimate(
            flops=2 * M * K * 2 * npad, transcendentals=M * npad,
            bytes_accessed=2 * M * K + 2 * K * 2 * npad + 16 * M * npad),
    )(patches, w_cat, b_cat, eps)


# ----------------------------------------------------------------------------
# Glue: NHWC im2col + weight layout / lane padding (plain JAX)
# ----------------------------------------------------------------------------
def im2col_nhwc(x, kh, kw, stride, pad):
    """x: [B, H, W, C] -> patches [B*Ho*Wo, kh*kw*C] (tap-major, channel-minor)."""
    B, H, W, C = x.shape
    xp = jnp.pad(x, ((0, 0), (pad, pad), (pad, pad), (0, 0)))
    Ho = (H + 2 * pad - kh) // stride + 1
    Wo = (W + 2 * pad - kw) // stride + 1
    taps = [xp[:, i:i + stride * Ho:stride, j:j + stride * Wo:stride, :]
            for i in range(kh) for j in range(kw)]
    col = jnp.stack(taps, axis=3).reshape(B * Ho * Wo, kh * kw * C)
    return col, Ho, Wo


def conv_weight_to_matrix(w, cpad):
    """PyTorch conv weight [Cout, Cin, kh, kw] -> [kh*kw*Cin, Cpad] (lane-padded)."""
    cout, cin, kh, kw = w.shape
    wm = jnp.transpose(w, (2, 3, 1, 0)).reshape(kh * kw * cin, cout)
    if cpad > cout:
        wm = jnp.pad(wm, ((0, 0), (0, cpad - cout)))
    return wm


# ----------------------------------------------------------------------------
# Encoder forward
# ----------------------------------------------------------------------------
def init_encoder_params(key, isize, nz, nc, ngf):
    assert isize % 16 == 0
    n = int(math.log2(isize))
    assert 2 ** n == isize
    params = {"main": []}
    k = key

    def nrm(kk, shape):
        return jax.random.normal(kk, shape, dtype=jnp.float32) * 0.02

    k, sub = jax.random.split(k)
    params["main"].append(nrm(sub, (ngf, nc, 4, 4)))              # input conv (no bias)
    for i in range(n - 3):                                        # pyramid convs (no bias)
        k, sub = jax.random.split(k)
        params["main"].append(nrm(sub, (ngf * 2 ** (i + 1), ngf * 2 ** i, 4, 4)))
    cfinal = ngf * 2 ** (n - 3)
    k, s1, s2, s3, s4 = jax.random.split(k, 5)
    params["conv1_w"] = nrm(s1, (nz, cfinal, 4, 4))
    params["conv1_b"] = nrm(s2, (nz,))
    params["conv2_w"] = nrm(s3, (nz, cfinal, 4, 4))
    params["conv2_b"] = nrm(s4, (nz,))
    return params


def encoder_forward(params, x, eps_key):
    """x: [B, nc, isize, isize] (NCHW).  Returns [z, mu, logvar], each [B, nz, 1, 1]."""
    B = x.shape[0]
    h = jnp.transpose(x, (0, 2, 3, 1)).astype(jnp.bfloat16)      # NCHW -> NHWC bf16, once

    # main: (conv k=4 s=2 p=1, no bias) -> BatchNorm(batch stats) -> ReLU, all bf16.
    for w in params["main"]:
        cout = w.shape[0]
        cpad = _round_up(cout, 128)
        patches, Ho, Wo = im2col_nhwc(h, 4, 4, stride=2, pad=1)
        y = conv_bn_relu(patches, conv_weight_to_matrix(w, cpad).astype(jnp.bfloat16))
        h = y.reshape(B, Ho, Wo, cpad)
        if cpad != cout:
            # Drop lane padding only when it exists; with XLA-side im2col this
            # is cheaper than inflating the next layer's K by cpad/cout.
            h = h[..., :cout]

    # heads: conv1 / conv2 (k=4, s=1, p=0, bias) fused into one matmul + reparametrize.
    patches, Ho, Wo = im2col_nhwc(h, 4, 4, stride=1, pad=0)       # Ho = Wo = 1
    nz = params["conv1_w"].shape[0]
    npad = _round_up(nz, 128)
    w_cat = jnp.concatenate(
        [conv_weight_to_matrix(params["conv1_w"], npad),
         conv_weight_to_matrix(params["conv2_w"], npad)], axis=1).astype(jnp.bfloat16)
    b_cat = jnp.concatenate(
        [jnp.pad(params["conv1_b"], (0, npad - nz)),
         jnp.pad(params["conv2_b"], (0, npad - nz))]).reshape(1, 2 * npad)
    M = patches.shape[0]                                          # == B (Ho = Wo = 1)
    # TODO(synk): generate eps in-kernel via pltpu.prng_seed / stateful_normal.
    eps = jax.random.normal(eps_key, (M, npad), dtype=jnp.float32)

    z, mu, lv = head(patches, w_cat, b_cat, eps, npad)
    z = z[:, :nz].reshape(B, nz, 1, 1)
    mu = mu[:, :nz].reshape(B, nz, 1, 1)
    lv = lv[:, :nz].reshape(B, nz, 1, 1)
    return [z, mu, lv]


# ----------------------------------------------------------------------------
if __name__ == "__main__":
    # Small but valid configuration: isize=16 (power of 2, multiple of 16).
    isize, nz, nc, ngf, B = 16, 8, 3, 8, 2

    key = jax.random.PRNGKey(0)
    pkey, xkey, ekey = jax.random.split(key, 3)
    params = init_encoder_params(pkey, isize, nz, nc, ngf)
    x = jax.random.normal(xkey, (B, nc, isize, isize), dtype=jnp.float32)

    fwd = jax.jit(encoder_forward)
    z, mu, logvar = fwd(params, x, ekey)
    jax.block_until_ready((z, mu, logvar))

    assert z.shape == (B, nz, 1, 1)
    assert mu.shape == (B, nz, 1, 1)
    assert logvar.shape == (B, nz, 1, 1)
    assert bool(jnp.all(jnp.isfinite(z)))
    assert bool(jnp.all(jnp.isfinite(mu)))
    assert bool(jnp.all(jnp.isfinite(logvar)))
    print("KERNEL_OK")
</pallas_src>

<mosaic_0001>
module attributes {stable_mosaic.version = 11 : i64} {
  func.func @_bn_relu_kernel(%arg0: i32, %arg1: memref<2x128xf32, #tpu.memory_space<vmem>>, %arg2: memref<128x128xbf16, #tpu.memory_space<vmem>>, %arg3: memref<128x128xbf16, #tpu.memory_space<vmem>>) attributes {dimension_semantics = [#tpu.dimension_semantics<parallel>], iteration_bounds = array<i64: 1>, scalar_prefetch = 0 : i64, scratch_operands = 0 : i64, tpu.core_type = #tpu.core_type<tc>, window_params = [{pipeline_mode = #tpu.pipeline_mode<synchronous>, transform_indices = @transform_0, window_bounds = array<i64: 2, 128>}, {transform_indices = @transform_1, window_bounds = array<i64: 128, 128>}, {transform_indices = @transform_2, window_bounds = array<i64: 128, 128>}]} {
    %c0 = arith.constant 0 : index
    %c0_0 = arith.constant 0 : index
    %0 = vector.load %arg1[%c0, %c0_0] : memref<2x128xf32, #tpu.memory_space<vmem>>, vector<1x128xf32>
    %cst = arith.constant 7.812500e-03 : f32
    %1 = vector.broadcast %cst : f32 to vector<1x128xf32>
    %2 = arith.mulf %0, %1 : vector<1x128xf32>
    %c1 = arith.constant 1 : index
    %c0_1 = arith.constant 0 : index
    %3 = vector.load %arg1[%c1, %c0_1] : memref<2x128xf32, #tpu.memory_space<vmem>>, vector<1x128xf32>
    %cst_2 = arith.constant 7.812500e-03 : f32
    %4 = vector.broadcast %cst_2 : f32 to vector<1x128xf32>
    %5 = arith.mulf %3, %4 : vector<1x128xf32>
    %6 = arith.mulf %2, %2 : vector<1x128xf32>
    %7 = arith.subf %5, %6 : vector<1x128xf32>
    %cst_3 = arith.constant 0.000000e+00 : f32
    %8 = vector.broadcast %cst_3 : f32 to vector<1x128xf32>
    %9 = arith.maximumf %7, %8 : vector<1x128xf32>
    %cst_4 = arith.constant 9.99999974E-6 : f32
    %10 = vector.broadcast %cst_4 : f32 to vector<1x128xf32>
    %11 = arith.addf %9, %10 : vector<1x128xf32>
    %12 = math.rsqrt %11 : vector<1x128xf32>
    %c0_5 = arith.constant 0 : index
    %c0_6 = arith.constant 0 : index
    %13 = vector.load %arg2[%c0_5, %c0_6] : memref<128x128xbf16, #tpu.memory_space<vmem>>, vector<128x128xbf16>
    %14 = arith.extf %13 : vector<128x128xbf16> to vector<128x128xf32>
    %15 = vector.broadcast %2 : vector<1x128xf32> to vector<128x128xf32>
    %16 = arith.subf %14, %15 : vector<128x128xf32>
    %17 = vector.broadcast %12 : vector<1x128xf32> to vector<128x128xf32>
    %18 = arith.mulf %16, %17 : vector<128x128xf32>
    %cst_7 = arith.constant 0.000000e+00 : f32
    %19 = vector.broadcast %cst_7 : f32 to vector<128x128xf32>
    %20 = arith.maximumf %18, %19 : vector<128x128xf32>
    %21 = arith.truncf %20 : vector<128x128xf32> to vector<128x128xbf16>
    %c0_8 = arith.constant 0 : index
    %c0_9 = arith.constant 0 : index
    %22 = vector.load %arg3[%c0_8, %c0_9] : memref<128x128xbf16, #tpu.memory_space<vmem>>, vector<128x128xbf16>
    tpu.vector_store %arg3[%c0_8, %c0_9], %21 {strides = array<i32>} : memref<128x128xbf16, #tpu.memory_space<vmem>>, vector<128x128xbf16>,
    return
  }
  func.func @transform_0(%arg0: i32) -> (i32, i32) {
    %c0_i32 = arith.constant 0 : i32
    %c0_i32_0 = arith.constant 0 : i32
    %c0_i32_1 = arith.constant 0 : i32
    return %c0_i32, %c0_i32_0 : i32, i32
  }
  func.func @transform_1(%arg0: i32) -> (i32, i32) {
    %c0_i32 = arith.constant 0 : i32
    %c0_i32_0 = arith.constant 0 : i32
    return %arg0, %c0_i32 : i32, i32
  }
  func.func @transform_2(%arg0: i32) -> (i32, i32) {
    %c0_i32 = arith.constant 0 : i32
    %c0_i32_0 = arith.constant 0 : i32
    return %arg0, %c0_i32 : i32, i32
  }
}

module attributes {stable_mosaic.version = 11 : i64} {
  func.func @_conv_stats_kernel(%arg0: i32, %arg1: memref<128x48xbf16, #tpu.memory_space<vmem>>, %arg2: memref<48x128xbf16, #tpu.memory_space<vmem>>, %arg3: memref<128x128xbf16, #tpu.memory_space<vmem>>, %arg4: memref<1x2x128xf32, #tpu.memory_space<vmem>>) attributes {dimension_semantics = [#tpu.dimension_semantics<parallel>], iteration_bounds = array<i64: 1>, scalar_prefetch = 0 : i64, scratch_operands = 0 : i64, tpu.core_type = #tpu.core_type<tc>, window_params = [{transform_indices = @transform_0, window_bounds = array<i64: 128, 48>}, {pipeline_mode = #tpu.pipeline_mode<synchronous>, transform_indices = @transform_1, window_bounds = array<i64: 48, 128>}, {transform_indices = @transform_2, window_bounds = array<i64: 128, 128>}, {transform_indices = @transform_3, window_bounds = array<i64: 1, 2, 128>}]} {
    %c0 = arith.constant 0 : index
    %c0_0 = arith.constant 0 : index
    %0 = vector.load %arg1[%c0, %c0_0] : memref<128x48xbf16, #tpu.memory_space<vmem>>, vector<128x48xbf16>
    %c0_1 = arith.constant 0 : index
    %c0_2 = arith.constant 0 : index
    %1 = vector.load %arg2[%c0_1, %c0_2] : memref<48x128xbf16, #tpu.memory_space<vmem>>, vector<48x128xbf16>
    %cst = arith.constant dense<0.000000e+00> : vector<128x128xf32>
    %2 = tpu.matmul %0, %1, %cst {dimension_numbers = #tpu.dot_dimension_numbers<[1], [0], [0], [1], [0, 0, 1, 1], [], []>} : vector<128x48xbf16>, vector<48x128xbf16>, vector<128x128xf32> -> vector<128x128xf32>
    %3 = arith.truncf %2 : vector<128x128xf32> to vector<128x128xbf16>
    %c0_3 = arith.constant 0 : index
    %c0_4 = arith.constant 0 : index
    %4 = vector.load %arg3[%c0_3, %c0_4] : memref<128x128xbf16, #tpu.memory_space<vmem>>, vector<128x128xbf16>
    tpu.vector_store %arg3[%c0_3, %c0_4], %3 {strides = array<i32>} : memref<128x128xbf16, #tpu.memory_space<vmem>>, vector<128x128xbf16>,
    %cst_5 = arith.constant dense<0.000000e+00> : vector<128xf32>
    %5 = vector.multi_reduction <add>, %2, %cst_5 [0] : vector<128x128xf32> to vector<128xf32>
    %6 = vector.shape_cast %5 : vector<128xf32> to vector<1x128xf32>
    %7 = arith.mulf %2, %2 : vector<128x128xf32>
    %cst_6 = arith.constant dense<0.000000e+00> : vector<128xf32>
    %8 = vector.multi_reduction <add>, %7, %cst_6 [0] : vector<128x128xf32> to vector<128xf32>
    %9 = vector.shape_cast %8 : vector<128xf32> to vector<1x128xf32>
    %10 = tpu.concatenate %6, %9 in 0 : vector<1x128xf32>, vector<1x128xf32> -> vector<2x128xf32>
    %c0_7 = arith.constant 0 : index
    %c0_8 = arith.constant 0 : index
    %c0_9 = arith.constant 0 : index
    %11 = vector.load %arg4[%c0_7, %c0_8, %c0_9] : memref<1x2x128xf32, #tpu.memory_space<vmem>>, vector<1x2x128xf32>
    %12 = vector.shape_cast %11 : vector<1x2x128xf32> to vector<2x128xf32>
    %13 = vector.shape_cast %10 : vector<2x128xf32> to vector<1x2x128xf32>
    tpu.vector_store %arg4[%c0_7, %c0_8, %c0_9], %13 {strides = array<i32>} : memref<1x2x128xf32, #tpu.memory_space<vmem>>, vector<1x2x128xf32>,
    return
  }
  func.func @transform_0(%arg0: i32) -> (i32, i32) {
    %c0_i32 = arith.constant 0 : i32
    %c0_i32_0 = arith.constant 0 : i32
    return %arg0, %c0_i32 : i32, i32
  }
  func.func @transform_1(%arg0: i32) -> (i32, i32) {
    %c0_i32 = arith.constant 0 : i32
    %c0_i32_0 = arith.constant 0 : i32
    %c0_i32_1 = arith.constant 0 : i32
    return %c0_i32, %c0_i32_0 : i32, i32
  }
  func.func @transform_2(%arg0: i32) -> (i32, i32) {
    %c0_i32 = arith.constant 0 : i32
    %c0_i32_0 = arith.constant 0 : i32
    return %arg0, %c0_i32 : i32, i32
  }
  func.func @transform_3(%arg0: i32) -> (i32, i32, i32) {
    %c0_i32 = arith.constant 0 : i32
    %c0_i32_0 = arith.constant 0 : i32
    %c0_i32_1 = arith.constant 0 : i32
    return %arg0, %c0_i32, %c0_i32_0 : i32, i32, i32
  }
}

module attributes {stable_mosaic.version = 11 : i64} {
  func.func @_bn_relu_kernel(%arg0: i32, %arg1: memref<2x128xf32, #tpu.memory_space<vmem>>, %arg2: memref<32x128xbf16, #tpu.memory_space<vmem>>, %arg3: memref<32x128xbf16, #tpu.memory_space<vmem>>) attributes {dimension_semantics = [#tpu.dimension_semantics<parallel>], iteration_bounds = array<i64: 1>, scalar_prefetch = 0 : i64, scratch_operands = 0 : i64, tpu.core_type = #tpu.core_type<tc>, window_params = [{pipeline_mode = #tpu.pipeline_mode<synchronous>, transform_indices = @transform_0, window_bounds = array<i64: 2, 128>}, {transform_indices = @transform_1, window_bounds = array<i64: 32, 128>}, {transform_indices = @transform_2, window_bounds = array<i64: 32, 128>}]} {
    %c0 = arith.constant 0 : index
    %c0_0 = arith.constant 0 : index
    %0 = vector.load %arg1[%c0, %c0_0] : memref<2x128xf32, #tpu.memory_space<vmem>>, vector<1x128xf32>
    %cst = arith.constant 3.125000e-02 : f32
    %1 = vector.broadcast %cst : f32 to vector<1x128xf32>
    %2 = arith.mulf %0, %1 : vector<1x128xf32>
    %c1 = arith.constant 1 : index
    %c0_1 = arith.constant 0 : index
    %3 = vector.load %arg1[%c1, %c0_1] : memref<2x128xf32, #tpu.memory_space<vmem>>, vector<1x128xf32>
    %cst_2 = arith.constant 3.125000e-02 : f32
    %4 = vector.broadcast %cst_2 : f32 to vector<1x128xf32>
    %5 = arith.mulf %3, %4 : vector<1x128xf32>
    %6 = arith.mulf %2, %2 : vector<1x128xf32>
    %7 = arith.subf %5, %6 : vector<1x128xf32>
    %cst_3 = arith.constant 0.000000e+00 : f32
    %8 = vector.broadcast %cst_3 : f32 to vector<1x128xf32>
    %9 = arith.maximumf %7, %8 : vector<1x128xf32>
    %cst_4 = arith.constant 9.99999974E-6 : f32
    %10 = vector.broadcast %cst_4 : f32 to vector<1x128xf32>
    %11 = arith.addf %9, %10 : vector<1x128xf32>
    %12 = math.rsqrt %11 : vector<1x128xf32>
    %c0_5 = arith.constant 0 : index
    %c0_6 = arith.constant 0 : index
    %13 = vector.load %arg2[%c0_5, %c0_6] : memref<32x128xbf16, #tpu.memory_space<vmem>>, vector<32x128xbf16>
    %14 = arith.extf %13 : vector<32x128xbf16> to vector<32x128xf32>
    %15 = vector.broadcast %2 : vector<1x128xf32> to vector<32x128xf32>
    %16 = arith.subf %14, %15 : vector<32x128xf32>
    %17 = vector.broadcast %12 : vector<1x128xf32> to vector<32x128xf32>
    %18 = arith.mulf %16, %17 : vector<32x128xf32>
    %cst_7 = arith.constant 0.000000e+00 : f32
    %19 = vector.broadcast %cst_7 : f32 to vector<32x128xf32>
    %20 = arith.maximumf %18, %19 : vector<32x128xf32>
    %21 = arith.truncf %20 : vector<32x128xf32> to vector<32x128xbf16>
    %c0_8 = arith.constant 0 : index
    %c0_9 = arith.constant 0 : index
    %22 = vector.load %arg3[%c0_8, %c0_9] : memref<32x128xbf16, #tpu.memory_space<vmem>>, vector<32x128xbf16>
    tpu.vector_store %arg3[%c0_8, %c0_9], %21 {strides = array<i32>} : memref<32x128xbf16, #tpu.memory_space<vmem>>, vector<32x128xbf16>,
    return
  }
  func.func @transform_0(%arg0: i32) -> (i32, i32) {
    %c0_i32 = arith.constant 0 : i32
    %c0_i32_0 = arith.constant 0 : i32
    %c0_i32_1 = arith.constant 0 : i32
    return %c0_i32, %c0_i32_0 : i32, i32
  }
  func.func @transform_1(%arg0: i32) -> (i32, i32) {
    %c0_i32 = arith.constant 0 : i32
    %c0_i32_0 = arith.constant 0 : i32
    return %arg0, %c0_i32 : i32, i32
  }
  func.func @transform_2(%arg0: i32) -> (i32, i32) {
    %c0_i32 = arith.constant 0 : i32
    %c0_i32_0 = arith.constant 0 : i32
    return %arg0, %c0_i32 : i32, i32
  }
}

module attributes {stable_mosaic.version = 11 : i64} {
  func.func @_conv_stats_kernel(%arg0: i32, %arg1: memref<32x128xbf16, #tpu.memory_space<vmem>>, %arg2: memref<128x128xbf16, #tpu.memory_space<vmem>>, %arg3: memref<32x128xbf16, #tpu.memory_space<vmem>>, %arg4: memref<1x2x128xf32, #tpu.memory_space<vmem>>) attributes {dimension_semantics = [#tpu.dimension_semantics<parallel>], iteration_bounds = array<i64: 1>, scalar_prefetch = 0 : i64, scratch_operands = 0 : i64, tpu.core_type = #tpu.core_type<tc>, window_params = [{transform_indices = @transform_0, window_bounds = array<i64: 32, 128>}, {pipeline_mode = #tpu.pipeline_mode<synchronous>, transform_indices = @transform_1, window_bounds = array<i64: 128, 128>}, {transform_indices = @transform_2, window_bounds = array<i64: 32, 128>}, {transform_indices = @transform_3, window_bounds = array<i64: 1, 2, 128>}]} {
    %c0 = arith.constant 0 : index
    %c0_0 = arith.constant 0 : index
    %0 = vector.load %arg1[%c0, %c0_0] : memref<32x128xbf16, #tpu.memory_space<vmem>>, vector<32x128xbf16>
    %c0_1 = arith.constant 0 : index
    %c0_2 = arith.constant 0 : index
    %1 = vector.load %arg2[%c0_1, %c0_2] : memref<128x128xbf16, #tpu.memory_space<vmem>>, vector<128x128xbf16>
    %cst = arith.constant dense<0.000000e+00> : vector<32x128xf32>
    %2 = tpu.matmul %0, %1, %cst {dimension_numbers = #tpu.dot_dimension_numbers<[1], [0], [0], [1], [0, 0, 1, 1], [], []>} : vector<32x128xbf16>, vector<128x128xbf16>, vector<32x128xf32> -> vector<32x128xf32>
    %3 = arith.truncf %2 : vector<32x128xf32> to vector<32x128xbf16>
    %c0_3 = arith.constant 0 : index
    %c0_4 = arith.constant 0 : index
    %4 = vector.load %arg3[%c0_3, %c0_4] : memref<32x128xbf16, #tpu.memory_space<vmem>>, vector<32x128xbf16>
    tpu.vector_store %arg3[%c0_3, %c0_4], %3 {strides = array<i32>} : memref<32x128xbf16, #tpu.memory_space<vmem>>, vector<32x128xbf16>,
    %cst_5 = arith.constant dense<0.000000e+00> : vector<128xf32>
    %5 = vector.multi_reduction <add>, %2, %cst_5 [0] : vector<32x128xf32> to vector<128xf32>
    %6 = vector.shape_cast %5 : vector<128xf32> to vector<1x128xf32>
    %7 = arith.mulf %2, %2 : vector<32x128xf32>
    %cst_6 = arith.constant dense<0.000000e+00> : vector<128xf32>
    %8 = vector.multi_reduction <add>, %7, %cst_6 [0] : vector<32x128xf32> to vector<128xf32>
    %9 = vector.shape_cast %8 : vector<128xf32> to vector<1x128xf32>
    %10 = tpu.concatenate %6, %9 in 0 : vector<1x128xf32>, vector<1x128xf32> -> vector<2x128xf32>
    %c0_7 = arith.constant 0 : index
    %c0_8 = arith.constant 0 : index
    %c0_9 = arith.constant 0 : index
    %11 = vector.load %arg4[%c0_7, %c0_8, %c0_9] : memref<1x2x128xf32, #tpu.memory_space<vmem>>, vector<1x2x128xf32>
    %12 = vector.shape_cast %11 : vector<1x2x128xf32> to vector<2x128xf32>
    %13 = vector.shape_cast %10 : vector<2x128xf32> to vector<1x2x128xf32>
    tpu.vector_store %arg4[%c0_7, %c0_8, %c0_9], %13 {strides = array<i32>} : memref<1x2x128xf32, #tpu.memory_space<vmem>>, vector<1x2x128xf32>,
    return
  }
  func.func @transform_0(%arg0: i32) -> (i32, i32) {
    %c0_i32 = arith.constant 0 : i32
    %c0_i32_0 = arith.constant 0 : i32
    return %arg0, %c0_i32 : i32, i32
  }
  func.func @transform_1(%arg0: i32) -> (i32, i32) {
    %c0_i32 = arith.constant 0 : i32
    %c0_i32_0 = arith.constant 0 : i32
    %c0_i32_1 = arith.constant 0 : i32
    return %c0_i32, %c0_i32_0 : i32, i32
  }
  func.func @transform_2(%arg0: i32) -> (i32, i32) {
    %c0_i32 = arith.constant 0 : i32
    %c0_i32_0 = arith.constant 0 : i32
    return %arg0, %c0_i32 : i32, i32
  }
  func.func @transform_3(%arg0: i32) -> (i32, i32, i32) {
    %c0_i32 = arith.constant 0 : i32
    %c0_i32_0 = arith.constant 0 : i32
    %c0_i32_1 = arith.constant 0 : i32
    return %arg0, %c0_i32, %c0_i32_0 : i32, i32, i32
  }
}

module attributes {stable_mosaic.version = 11 : i64} {
  func.func @_head_kernel(%arg0: i32, %arg1: memref<2x256xbf16, #tpu.memory_space<vmem>>, %arg2: memref<256x256xbf16, #tpu.memory_space<vmem>>, %arg3: memref<1x256xf32, #tpu.memory_space<vmem>>, %arg4: memref<2x128xf32, #tpu.memory_space<vmem>>, %arg5: memref<2x128xf32, #tpu.memory_space<vmem>>, %arg6: memref<2x128xf32, #tpu.memory_space<vmem>>, %arg7: memref<2x128xf32, #tpu.memory_space<vmem>>) attributes {dimension_semantics = [#tpu.dimension_semantics<parallel>], iteration_bounds = array<i64: 1>, scalar_prefetch = 0 : i64, scratch_operands = 0 : i64, tpu.core_type = #tpu.core_type<tc>, window_params = [{transform_indices = @transform_0, window_bounds = array<i64: 2, 256>}, {pipeline_mode = #tpu.pipeline_mode<synchronous>, transform_indices = @transform_1, window_bounds = array<i64: 256, 256>}, {pipeline_mode = #tpu.pipeline_mode<synchronous>, transform_indices = @transform_2, window_bounds = array<i64: 1, 256>}, {transform_indices = @transform_3, window_bounds = array<i64: 2, 128>}, {transform_indices = @transform_4, window_bounds = array<i64: 2, 128>}, {transform_indices = @transform_5, window_bounds = array<i64: 2, 128>}, {transform_indices = @transform_6, window_bounds = array<i64: 2, 128>}]} {
    %c0 = arith.constant 0 : index
    %c0_0 = arith.constant 0 : index
    %0 = vector.load %arg1[%c0, %c0_0] : memref<2x256xbf16, #tpu.memory_space<vmem>>, vector<2x256xbf16>
    %c0_1 = arith.constant 0 : index
    %c0_2 = arith.constant 0 : index
    %1 = vector.load %arg2[%c0_1, %c0_2] : memref<256x256xbf16, #tpu.memory_space<vmem>>, vector<256x256xbf16>
    %cst = arith.constant dense<0.000000e+00> : vector<2x256xf32>
    %2 = tpu.matmul %0, %1, %cst {dimension_numbers = #tpu.dot_dimension_numbers<[1], [0], [0], [1], [0, 0, 1, 1], [], []>} : vector<2x256xbf16>, vector<256x256xbf16>, vector<2x256xf32> -> vector<2x256xf32>
    %c0_3 = arith.constant 0 : index
    %c0_4 = arith.constant 0 : index
    %3 = vector.load %arg3[%c0_3, %c0_4] : memref<1x256xf32, #tpu.memory_space<vmem>>, vector<1x256xf32>
    %4 = vector.broadcast %3 : vector<1x256xf32> to vector<2x256xf32>
    %5 = arith.addf %2, %4 : vector<2x256xf32>
    %6 = vector.extract_strided_slice %5 {offsets = [0, 0], sizes = [2, 128], strides = [1, 1]} : vector<2x256xf32> to vector<2x128xf32>
    %7 = vector.extract_strided_slice %5 {offsets = [0, 128], sizes = [2, 128], strides = [1, 1]} : vector<2x256xf32> to vector<2x128xf32>
    %cst_5 = arith.constant 5.000000e-01 : f32
    %8 = vector.broadcast %cst_5 : f32 to vector<2x128xf32>
    %9 = arith.mulf %7, %8 : vector<2x128xf32>
    %10 = math.exp %9 : vector<2x128xf32>
    %c0_6 = arith.constant 0 : index
    %c0_7 = arith.constant 0 : index
    %11 = vector.load %arg4[%c0_6, %c0_7] : memref<2x128xf32, #tpu.memory_space<vmem>>, vector<2x128xf32>
    %12 = arith.mulf %10, %11 : vector<2x128xf32>
    %13 = arith.addf %6, %12 : vector<2x128xf32>
    %c0_8 = arith.constant 0 : index
    %c0_9 = arith.constant 0 : index
    %14 = vector.load %arg5[%c0_8, %c0_9] : memref<2x128xf32, #tpu.memory_space<vmem>>, vector<2x128xf32>
    tpu.vector_store %arg5[%c0_8, %c0_9], %13 {strides = array<i32>} : memref<2x128xf32, #tpu.memory_space<vmem>>, vector<2x128xf32>,
    %c0_10 = arith.constant 0 : index
    %c0_11 = arith.constant 0 : index
    %15 = vector.load %arg6[%c0_10, %c0_11] : memref<2x128xf32, #tpu.memory_space<vmem>>, vector<2x128xf32>
    tpu.vector_store %arg6[%c0_10, %c0_11], %6 {strides = array<i32>} : memref<2x128xf32, #tpu.memory_space<vmem>>, vector<2x128xf32>,
    %c0_12 = arith.constant 0 : index
    %c0_13 = arith.constant 0 : index
    %16 = vector.load %arg7[%c0_12, %c0_13] : memref<2x128xf32, #tpu.memory_space<vmem>>, vector<2x128xf32>
    tpu.vector_store %arg7[%c0_12, %c0_13], %7 {strides = array<i32>} : memref<2x128xf32, #tpu.memory_space<vmem>>, vector<2x128xf32>,
    return
  }
  func.func @transform_0(%arg0: i32) -> (i32, i32) {
    %c0_i32 = arith.constant 0 : i32
    %c0_i32_0 = arith.constant 0 : i32
    return %arg0, %c0_i32 : i32, i32
  }
  func.func @transform_1(%arg0: i32) -> (i32, i32) {
    %c0_i32 = arith.constant 0 : i32
    %c0_i32_0 = arith.constant 0 : i32
    %c0_i32_1 = arith.constant 0 : i32
    return %c0_i32, %c0_i32_0 : i32, i32
  }
  func.func @transform_2(%arg0: i32) -> (i32, i32) {
    %c0_i32 = arith.constant 0 : i32
    %c0_i32_0 = arith.constant 0 : i32
    %c0_i32_1 = arith.constant 0 : i32
    return %c0_i32, %c0_i32_0 : i32, i32
  }
  func.func @transform_3(%arg0: i32) -> (i32, i32) {
    %c0_i32 = arith.constant 0 : i32
    %c0_i32_0 = arith.constant 0 : i32
    return %arg0, %c0_i32 : i32, i32
  }
  func.func @transform_4(%arg0: i32) -> (i32, i32) {
    %c0_i32 = arith.constant 0 : i32
    %c0_i32_0 = arith.constant 0 : i32
    return %arg0, %c0_i32 : i32, i32
  }
  func.func @transform_5(%arg0: i32) -> (i32, i32) {
    %c0_i32 = arith.constant 0 : i32
    %c0_i32_0 = arith.constant 0 : i32
    return %arg0, %c0_i32 : i32, i32
  }
  func.func @transform_6(%arg0: i32) -> (i32, i32) {
    %c0_i32 = arith.constant 0 : i32
    %c0_i32_0 = arith.constant 0 : i32
    return %arg0, %c0_i32 : i32, i32
  }
}

</mosaic_0001>

<bundles_post_ra>
// kernel: encoder_forward.5
= control target key start
LH: loop header
LB: loop body
LE: loop exit
PB: predicated region body
PF: predicated region fallthrough
CT: control target
= control target key end

     0   :  { %vm94_vm0 = vcmask 392192   ;;  %vm354_vm1 = vcmask 1040384   ;;  %s601_s1 = inlined_call_operand.vmem [shape: bf16[48,128], index: 1, kind: input, shape index: {}]   ;;  %s602_s0 = inlined_call_operand.vmem [shape: bf16[128,48], index: 0, kind: input, shape index: {}]   ;;  %s603_s2 = inlined_call_operand.vmem [shape: bf16[128,128], index: 2, kind: output, shape index: {0}]   ;;  %s604_s3 = inlined_call_operand.vmem [shape: f32[1,2,128], index: 3, kind: output, shape index: {1}]  }
   0x1   :  { %v502_v0 = vld [vmem:[%s601_s1] sm:$0xff]   ;;  %v503_v1 = vld [vmem:[%s601_s1 + $0x8] sm:$0xff]   ;;  %v504_v3 = vld [vmem:[%s601_s1 + $0x10] sm:$0xff]  }
   0x2   :  { %474 = vmatprep.subr.bf16.mxu0 %v502_v0  ;;  %496 = vmatprep.subr.bf16.mxu1 %v502_v0  ;;  %v505_v2 = vld [vmem:[%s602_s0] sm:$0xff]   ;;  %v506_v5 = vld [vmem:[%s602_s0 + $0x8] sm:$0xff]   ;;  %v507_v7 = vld [vmem:[%s602_s0 + $0x10] sm:$0xff]  }
   0x3   :  { %475 = vmatpush3.bf16.msra.mxu0 %v502_v0  ;;  %499 = vmatpush3.bf16.msra.mxu1 %v502_v0  ;;  %v509_v4 = vld [vmem:[%s602_s0 + $0x20] sm:$0xff]   ;;  %v510_v6 = vld [vmem:[%s602_s0 + $0x28] sm:$0xff]   ;;  %v511_v8 = vld [vmem:[%s602_s0 + $0x30] sm:$0xff]  }
   0x4   :  { %476 = vmatprep.subr.bf16.mxu0 %v503_v1  ;;  %497 = vmatprep.subr.bf16.mxu1 %v503_v1  ;;  %v508_v9 = vld [vmem:[%s602_s0 + $0x18] sm:$0xff]  }
   0x5   :  { %480 = vmatprep.mubr.msk.bf16.mxu0 %vm94_vm0, %v505_v2  ;;  %488 = vmatprep.mubr.msk.bf16.mxu1 %vm94_vm0, %v509_v4  ;;  %v512_v10 = vld [vmem:[%s602_s0 + $0x38] sm:$0xff]  }
   0x7   :  { %477 = vmatpush3.bf16.msra.mxu0 %v503_v1  ;;  %500 = vmatpush3.bf16.msra.mxu1 %v503_v1 }
   0x8   :  { %478 = vmatprep.subr.bf16.mxu0 %v504_v3  ;;  %498 = vmatprep.subr.bf16.mxu1 %v504_v3 }
   0xb   :  { %479 = vmatpush3.bf16.msra.mxu0 %v504_v3  ;;  %501 = vmatpush3.bf16.msra.mxu1 %v504_v3 }
   0xe   :  { %481 = vmatmul.mubr.msk.bf16.vlgmr.msra.gmra.mrb[0].mxu0 %vm94_vm0, %v506_v5  ;;  %489 = vmatmul.mubr.msk.bf16.vlgmr.msra.gmra.mrb[0].mxu1 %vm94_vm0, %v510_v6 }
   0xf   :  { %484 = vmatprep.mubr.msk.bf16.mxu0 %vm94_vm0, %v507_v7  ;;  %492 = vmatprep.mubr.msk.bf16.mxu1 %vm94_vm0, %v511_v8 }
  0x16   :  { %485 = vmatmul.mubr.msk.bf16.gmra.mrb[4].mxu0 %vm94_vm0, %v508_v9  ;;  %493 = vmatmul.mubr.msk.bf16.gmra.mrb[4].mxu1 %vm94_vm0, %v512_v10 }
  0xe1   :  { %v482_v11 = vpop.f32.mrb[0].mxu0  ;;  %v490_v12 = vpop.f32.mrb[0].mxu1 }
  0xe2   :  { %v153_v13 = vpop.f32.mrb[1].mxu0  ;;  %v185_v14 = vpop.f32.mrb[1].mxu1  ;;  %v319_v26 = vmul.f32 %v482_v11, %v482_v11  ;;  %v327_v62 = vmul.f32 %v490_v12, %v490_v12 }
  0xe3   :  { %v483_v15 = vpop.f32.mrb[2].mxu0  ;;  %v491_v16 = vpop.f32.mrb[2].mxu1  ;;  %v317_v17 = vmul.f32 %v153_v13, %v153_v13  ;;  %v325_v56 = vmul.f32 %v185_v14, %v185_v14 }
  0xe4   :  { %v424_v18 = vpack.c.bf16 %v483_v15, %v482_v11  ;;  %v156_v19 = vpop.f32.mrb[3].mxu0  ;;  %v444_v20 = vpack.c.bf16 %v491_v16, %v490_v12  ;;  %v188_v21 = vpop.f32.mrb[3].mxu1  ;;  %v320_v29 = vmul.f32 %v483_v15, %v483_v15  ;;  %v328_v1 = vmul.f32 %v491_v16, %v491_v16 }
  0xe5   :  { %v419_v22 = vpack.c.bf16 %v156_v19, %v153_v13  ;;  %v296_v23 = vadd.f32 %v156_v19, %v153_v13  ;;  %v318_v24 = vmul.f32 %v156_v19, %v156_v19  ;;  %v439_v25 = vpack.c.bf16 %v188_v21, %v185_v14 }
  0xe6   :  { %456 = vst [vmem:[%s603_s2 + $0x8] sm:$0xff] %v424_v18   ;;  %460 = vst [vmem:[%s603_s2 + $0x28] sm:$0xff] %v444_v20   ;;  %v326_v61 = vmul.f32 %v188_v21, %v188_v21 }
  0xe7   :  { %420 = vst [vmem:[%s603_s2] sm:$0xff] %v419_v22   ;;  %v297_v27 = vadd.f32 %v482_v11, %v296_v23  ;;  %v333_v28 = vadd.f32 %v318_v24, %v317_v17  ;;  %459 = vst [vmem:[%s603_s2 + $0x20] sm:$0xff] %v439_v25  }
  0xe9   :  { %v334_v30 = vadd.f32 %v333_v28, %v319_v26  ;;  %v486_v31 = vpop.f32.mrb[4].mxu0  ;;  %v298_v32 = vadd.f32 %v483_v15, %v297_v27  ;;  %v494_v33 = vpop.f32.mrb[4].mxu1 }
  0xea   :  { %v169_v34 = vpop.f32.mrb[5].mxu0  ;;  %v201_v35 = vpop.f32.mrb[5].mxu1  ;;  %v323_v50 = vmul.f32 %v486_v31, %v486_v31  ;;  %v331_v10 = vmul.f32 %v494_v33, %v494_v33 }
  0xeb   :  { %v299_v36 = vadd.f32 %v298_v32, %v169_v34  ;;  %v321_v37 = vmul.f32 %v169_v34, %v169_v34  ;;  %v335_v38 = vadd.f32 %v334_v30, %v320_v29  ;;  %v487_v39 = vpop.f32.mrb[6].mxu0  ;;  %v495_v40 = vpop.f32.mrb[6].mxu1  ;;  %v329_v4 = vmul.f32 %v201_v35, %v201_v35 }
  0xec   :  { %v434_v41 = vpack.c.bf16 %v487_v39, %v486_v31  ;;  %v172_v42 = vpop.f32.mrb[7].mxu0  ;;  %v454_v43 = vpack.c.bf16 %v495_v40, %v494_v33  ;;  %v204_v44 = vpop.f32.mrb[7].mxu1  ;;  %v324_v53 = vmul.f32 %v487_v39, %v487_v39 }
  0xed   :  { %v336_v45 = vadd.f32 %v335_v38, %v321_v37  ;;  %v429_v46 = vpack.c.bf16 %v172_v42, %v169_v34  ;;  %v300_v47 = vadd.f32 %v299_v36, %v172_v42  ;;  %v322_v48 = vmul.f32 %v172_v42, %v172_v42 }
  0xee   :  { %458 = vst [vmem:[%s603_s2 + $0x18] sm:$0xff] %v434_v41   ;;  %462 = vst [vmem:[%s603_s2 + $0x38] sm:$0xff] %v454_v43   ;;  %v449_v49 = vpack.c.bf16 %v204_v44, %v201_v35  ;;  %v330_v9 = vmul.f32 %v204_v44, %v204_v44 }
  0xef   :  { %457 = vst [vmem:[%s603_s2 + $0x10] sm:$0xff] %v429_v46   ;;  %v301_v51 = vadd.f32 %v486_v31, %v300_v47  ;;  %v337_v52 = vadd.f32 %v336_v45, %v322_v48 }
  0xf0   :  { %461 = vst [vmem:[%s603_s2 + $0x30] sm:$0xff] %v449_v49  }
  0xf1   :  { %v338_v54 = vadd.f32 %v337_v52, %v323_v50  ;;  %v302_v55 = vadd.f32 %v487_v39, %v301_v51 }
  0xf3   :  { %v303_v57 = vadd.f32 %v302_v55, %v185_v14  ;;  %v339_v58 = vadd.f32 %v338_v54, %v324_v53  ;;  %v332_v14 = vmul.f32 %v495_v40, %v495_v40 }
  0xf5   :  { %v340_v59 = vadd.f32 %v339_v58, %v325_v56  ;;  %v304_v60 = vadd.f32 %v303_v57, %v188_v21 }
  0xf7   :  { %v305_v63 = vadd.f32 %v490_v12, %v304_v60  ;;  %v341_v0 = vadd.f32 %v340_v59, %v326_v61 }
  0xf9   :  { %v342_v2 = vadd.f32 %v341_v0, %v327_v62  ;;  %v306_v3 = vadd.f32 %v491_v16, %v305_v63 }
  0xfb   :  { %v307_v5 = vadd.f32 %v306_v3, %v201_v35  ;;  %v343_v6 = vadd.f32 %v342_v2, %v328_v1 }
  0xfd   :  { %v344_v7 = vadd.f32 %v343_v6, %v329_v4  ;;  %v308_v8 = vadd.f32 %v307_v5, %v204_v44 }
  0xff   :  { %v309_v11 = vadd.f32 %v494_v33, %v308_v8  ;;  %v345_v13 = vadd.f32 %v344_v7, %v330_v9 }
 0x101   :  { %v310_v15 = vadd.f32 %v495_v40, %v309_v11  ;;  %v346_v17 = vadd.f32 %v345_v13, %v331_v10 }
 0x103   :  { %v311_v18 = vrot.slane %v310_v15, 4  ;;  %v347_v19 = vadd.f32 %v346_v17, %v332_v14 }
 0x105   :  { %v312_v20 = vadd.f32 %v311_v18, %v310_v15  ;;  %v348_v12 = vrot.slane %v347_v19, 4 }
 0x107   :  { %v313_v21 = vrot.slane %v312_v20, 2  ;;  %v349_v22 = vadd.f32 %v348_v12, %v347_v19 }
 0x109   :  { %v314_v23 = vadd.f32 %v313_v21, %v312_v20  ;;  %v350_v16 = vrot.slane %v349_v22, 2 }
 0x10b   :  { %v315_v24 = vrot.slane %v314_v23, 1  ;;  %v351_v25 = vadd.f32 %v350_v16, %v349_v22 }
 0x10d   :  { %v352_v26 = vrot.slane %v351_v25, 1  ;;  %v316_v27 = vadd.f32 %v315_v24, %v314_v23 }
 0x10f   :  { %v353_v28 = vadd.f32 %v352_v26, %v351_v25 }
 0x111   :  { %v355_v29 = vsel %vm354_vm1, %v316_v27, %v353_v28 }
 0x112   :  { %356 = vst [vmem:[%s604_s3] sm:$0x3] %v355_v29 }

// kernel: encoder_forward.6
= control target key start
LH: loop header
LB: loop body
LE: loop exit
PB: predicated region body
PF: predicated region fallthrough
CT: control target
= control target key end

     0   :  { %v52_v5 = vlaneseq  ;;  %s381_s0 = inlined_call_operand.vmem [shape: f32[2,128], index: 0, kind: input, shape index: {}]   ;;  %s382_s1 = inlined_call_operand.vmem [shape: bf16[128,128], index: 1, kind: input, shape index: {}]   ;;  %s383_s2 = inlined_call_operand.vmem [shape: bf16[128,128], index: 2, kind: output, shape index: {}]  }
   0x1   :  { %v11_v0 = vld [vmem:[%s381_s0] sm:$0x1]  ;;  %v13_v1 = vld [vmem:[%s381_s0 + $0x1] sm:$0x1]  ;;  %v296_v12 = vld [vmem:[%s382_s1 + $0x8] sm:$0xff]  }
   0x2   :  { %v12_v2 = vmul.f32 0.0078125, %v11_v0  ;;  %v14_v3 = vmul.f32 0.0078125, %v13_v1  ;;  %v53_v8 = vshrl.u32 %v52_v5, 7  ;;  %v225_v11 = vld [vmem:[%s382_s1] sm:$0xff]   ;;  %v297_v13 = vld [vmem:[%s382_s1 + $0x10] sm:$0xff]   ;;  %v298_v14 = vld [vmem:[%s382_s1 + $0x18] sm:$0xff]   ;;  %v230_v21 = vunpack.c.l.bf16 %v296_v12 }
   0x3   :  { %v299_v15 = vld [vmem:[%s382_s1 + $0x20] sm:$0xff]   ;;  %v226_v16 = vunpack.c.l.bf16 %v225_v11  ;;  %v300_v18 = vld [vmem:[%s382_s1 + $0x28] sm:$0xff]   ;;  %v301_v19 = vld [vmem:[%s382_s1 + $0x30] sm:$0xff]   ;;  %v227_v20 = vunpack.c.h.bf16 %v225_v11  ;;  %v231_v22 = vunpack.c.h.bf16 %v296_v12  ;;  %v234_v23 = vunpack.c.l.bf16 %v297_v13 }
   0x4   :  { %v15_v4 = vmul.f32 %v12_v2, %v12_v2  ;;  %v54_v10 = vsub.s32 0, %v53_v8  ;;  %v302_v24 = vld [vmem:[%s382_s1 + $0x38] sm:$0xff]   ;;  %v235_v25 = vunpack.c.h.bf16 %v297_v13  ;;  %v238_v26 = vunpack.c.l.bf16 %v298_v14 }
   0x5   :  { %v239_v27 = vunpack.c.h.bf16 %v298_v14  ;;  %v242_v28 = vunpack.c.l.bf16 %v299_v15  ;;  %v243_v29 = vunpack.c.h.bf16 %v299_v15  ;;  %v246_v30 = vunpack.c.l.bf16 %v300_v18 }
   0x6   :  { %v16_v6 = vsub.f32 %v14_v3, %v15_v4  ;;  %v55_v17 = vrot.slane %v12_v2, %v54_v10  ;;  %v247_v31 = vunpack.c.h.bf16 %v300_v18  ;;  %v250_v32 = vunpack.c.l.bf16 %v301_v19 }
   0x7   :  { %v251_v34 = vunpack.c.h.bf16 %v301_v19  ;;  %v254_v35 = vunpack.c.l.bf16 %v302_v24  ;;  %v255_v36 = vunpack.c.h.bf16 %v302_v24 }
   0x8   :  { %v17_v7 = vmax.f32 %v16_v6, 0.0  ;;  %v56_v33 = vsub.f32 %v226_v16, %v55_v17  ;;  %v57_v37 = vsub.f32 %v227_v20, %v55_v17  ;;  %v58_v38 = vsub.f32 %v230_v21, %v55_v17 }
   0x9   :  { %v59_v39 = vsub.f32 %v231_v22, %v55_v17  ;;  %v60_v40 = vsub.f32 %v234_v23, %v55_v17  ;;  %v61_v42 = vsub.f32 %v235_v25, %v55_v17  ;;  %v62_v43 = vsub.f32 %v238_v26, %v55_v17 }
   0xa   :  { %v18_v9 = vadd.f32 1e-05, %v17_v7  ;;  %v63_v44 = vsub.f32 %v239_v27, %v55_v17  ;;  %v64_v45 = vsub.f32 %v242_v28, %v55_v17  ;;  %v65_v47 = vsub.f32 %v243_v29, %v55_v17 }
   0xb   :  { %v66_v48 = vsub.f32 %v246_v30, %v55_v17  ;;  %v67_v49 = vsub.f32 %v247_v31, %v55_v17  ;;  %v68_v50 = vsub.f32 %v250_v32, %v55_v17  ;;  %v69_v51 = vsub.f32 %v251_v34, %v55_v17 }
   0xc   :  { %310 = vrsqrt.f32 %v18_v9  ;;  %v70_v52 = vsub.f32 %v254_v35, %v55_v17  ;;  %v71_v53 = vsub.f32 %v255_v36, %v55_v17 }
  0x16   :  { %v311_v41 = vpop.eup %310 }
  0x17   :  { %v75_v46 = vrot.slane %v311_v41, %v54_v10 }
  0x19   :  { %v76_v54 = vmul.f32 %v75_v46, %v56_v33  ;;  %v77_v55 = vmul.f32 %v75_v46, %v57_v37  ;;  %v78_v56 = vmul.f32 %v75_v46, %v58_v38  ;;  %v79_v57 = vmul.f32 %v75_v46, %v59_v39 }
  0x1a   :  { %v80_v58 = vmul.f32 %v75_v46, %v60_v40  ;;  %v81_v59 = vmul.f32 %v75_v46, %v61_v42  ;;  %v82_v60 = vmul.f32 %v75_v46, %v62_v43  ;;  %v83_v61 = vmul.f32 %v75_v46, %v63_v44 }
  0x1b   :  { %v92_v62 = vmax.f32 %v76_v54, 0.0  ;;  %v93_v63 = vmax.f32 %v77_v55, 0.0  ;;  %v94_v0 = vmax.f32 %v78_v56, 0.0  ;;  %v95_v1 = vmax.f32 %v79_v57, 0.0 }
  0x1c   :  { %v96_v2 = vmax.f32 %v80_v58, 0.0  ;;  %v97_v3 = vmax.f32 %v81_v59, 0.0  ;;  %v98_v4 = vmax.f32 %v82_v60, 0.0  ;;  %v99_v5 = vmax.f32 %v83_v61, 0.0 }
  0x1d   :  { %v259_v6 = vpack.c.bf16 %v93_v63, %v92_v62  ;;  %v264_v7 = vpack.c.bf16 %v95_v1, %v94_v0  ;;  %v84_v8 = vmul.f32 %v75_v46, %v64_v45  ;;  %v85_v9 = vmul.f32 %v75_v46, %v65_v47 }
  0x1e   :  { %v269_v10 = vpack.c.bf16 %v97_v3, %v96_v2  ;;  %v274_v11 = vpack.c.bf16 %v99_v5, %v98_v4  ;;  %v86_v12 = vmul.f32 %v75_v46, %v66_v48  ;;  %v87_v13 = vmul.f32 %v75_v46, %v67_v49 }
  0x1f   :  { %260 = vst [vmem:[%s383_s2] sm:$0xff] %v259_v6   ;;  %303 = vst [vmem:[%s383_s2 + $0x8] sm:$0xff] %v264_v7   ;;  %v100_v14 = vmax.f32 %v84_v8, 0.0  ;;  %v101_v15 = vmax.f32 %v85_v9, 0.0  ;;  %v88_v16 = vmul.f32 %v75_v46, %v68_v50  ;;  %v89_v17 = vmul.f32 %v75_v46, %v69_v51 }
  0x20   :  { %304 = vst [vmem:[%s383_s2 + $0x10] sm:$0xff] %v269_v10   ;;  %305 = vst [vmem:[%s383_s2 + $0x18] sm:$0xff] %v274_v11   ;;  %v102_v18 = vmax.f32 %v86_v12, 0.0  ;;  %v103_v19 = vmax.f32 %v87_v13, 0.0  ;;  %v90_v20 = vmul.f32 %v75_v46, %v70_v52  ;;  %v91_v21 = vmul.f32 %v75_v46, %v71_v53 }
  0x21   :  { %v279_v22 = vpack.c.bf16 %v101_v15, %v100_v14  ;;  %v104_v23 = vmax.f32 %v88_v16, 0.0  ;;  %v105_v24 = vmax.f32 %v89_v17, 0.0 }
  0x22   :  { %v284_v25 = vpack.c.bf16 %v103_v19, %v102_v18  ;;  %v106_v26 = vmax.f32 %v90_v20, 0.0  ;;  %v107_v27 = vmax.f32 %v91_v21, 0.0 }
  0x23   :  { %306 = vst [vmem:[%s383_s2 + $0x20] sm:$0xff] %v279_v22   ;;  %v289_v28 = vpack.c.bf16 %v105_v24, %v104_v23 }
  0x24   :  { %307 = vst [vmem:[%s383_s2 + $0x28] sm:$0xff] %v284_v25   ;;  %v294_v29 = vpack.c.bf16 %v107_v27, %v106_v26 }
  0x25   :  { %308 = vst [vmem:[%s383_s2 + $0x30] sm:$0xff] %v289_v28  }
  0x26   :  { %309 = vst [vmem:[%s383_s2 + $0x38] sm:$0xff] %v294_v29  }

// kernel: encoder_forward.8
= control target key start
LH: loop header
LB: loop body
LE: loop exit
PB: predicated region body
PF: predicated region fallthrough
CT: control target
= control target key end

     0   :  { %v28_v5 = vlaneseq  ;;  %s135_s0 = inlined_call_operand.vmem [shape: f32[2,128], index: 0, kind: input, shape index: {}]   ;;  %s136_s1 = inlined_call_operand.vmem [shape: bf16[32,128], index: 1, kind: input, shape index: {}]   ;;  %s137_s2 = inlined_call_operand.vmem [shape: bf16[32,128], index: 2, kind: output, shape index: {}]  }
   0x1   :  { %v11_v0 = vld [vmem:[%s135_s0] sm:$0x1]  ;;  %v13_v1 = vld [vmem:[%s135_s0 + $0x1] sm:$0x1]  ;;  %v98_v12 = vld [vmem:[%s136_s1 + $0x8] sm:$0xff]  }
   0x2   :  { %v12_v2 = vmul.f32 0.03125, %v11_v0  ;;  %v14_v3 = vmul.f32 0.03125, %v13_v1  ;;  %v29_v8 = vshrl.u32 %v28_v5, 7  ;;  %v81_v10 = vld [vmem:[%s136_s1] sm:$0xff]   ;;  %v86_v16 = vunpack.c.l.bf16 %v98_v12 }
   0x3   :  { %v82_v13 = vunpack.c.l.bf16 %v81_v10  ;;  %v83_v14 = vunpack.c.h.bf16 %v81_v10  ;;  %v87_v17 = vunpack.c.h.bf16 %v98_v12 }
   0x4   :  { %v15_v4 = vmul.f32 %v12_v2, %v12_v2  ;;  %v30_v11 = vsub.s32 0, %v29_v8 }
   0x6   :  { %v16_v6 = vsub.f32 %v14_v3, %v15_v4  ;;  %v31_v15 = vrot.slane %v12_v2, %v30_v11 }
   0x8   :  { %v17_v7 = vmax.f32 %v16_v6, 0.0  ;;  %v32_v18 = vsub.f32 %v82_v13, %v31_v15  ;;  %v33_v19 = vsub.f32 %v83_v14, %v31_v15  ;;  %v34_v20 = vsub.f32 %v86_v16, %v31_v15 }
   0x9   :  { %v35_v21 = vsub.f32 %v87_v17, %v31_v15 }
   0xa   :  { %v18_v9 = vadd.f32 1e-05, %v17_v7 }
   0xc   :  { %100 = vrsqrt.f32 %v18_v9 }
  0x16   :  { %v101_v22 = vpop.eup %100 }
  0x17   :  { %v39_v23 = vrot.slane %v101_v22, %v30_v11 }
  0x19   :  { %v40_v24 = vmul.f32 %v39_v23, %v32_v18  ;;  %v41_v25 = vmul.f32 %v39_v23, %v33_v19  ;;  %v42_v26 = vmul.f32 %v39_v23, %v34_v20  ;;  %v43_v27 = vmul.f32 %v39_v23, %v35_v21 }
  0x1b   :  { %v44_v28 = vmax.f32 %v40_v24, 0.0  ;;  %v45_v29 = vmax.f32 %v41_v25, 0.0  ;;  %v46_v30 = vmax.f32 %v42_v26, 0.0  ;;  %v47_v31 = vmax.f32 %v43_v27, 0.0 }
  0x1d   :  { %v91_v32 = vpack.c.bf16 %v45_v29, %v44_v28  ;;  %v96_v33 = vpack.c.bf16 %v47_v31, %v46_v30 }
  0x1f   :  { %92 = vst [vmem:[%s137_s2] sm:$0xff] %v91_v32   ;;  %99 = vst [vmem:[%s137_s2 + $0x8] sm:$0xff] %v96_v33  }

// kernel: encoder_forward.7
= control target key start
LH: loop header
LB: loop body
LE: loop exit
PB: predicated region body
PF: predicated region fallthrough
CT: control target
= control target key end

     0   :  { %vm185_vm0 = vcmask 1040384   ;;  %s324_s1 = inlined_call_operand.vmem [shape: bf16[128,128], index: 1, kind: input, shape index: {}]   ;;  %s325_s0 = inlined_call_operand.vmem [shape: bf16[32,128], index: 0, kind: input, shape index: {}]   ;;  %s326_s2 = inlined_call_operand.vmem [shape: bf16[32,128], index: 2, kind: output, shape index: {0}]   ;;  %s327_s3 = inlined_call_operand.vmem [shape: f32[1,2,128], index: 3, kind: output, shape index: {1}]  }
   0x1   :  { %v255_v0 = vld [vmem:[%s324_s1] sm:$0xff]   ;;  %v256_v1 = vld [vmem:[%s324_s1 + $0x8] sm:$0xff]   ;;  %v257_v2 = vld [vmem:[%s324_s1 + $0x10] sm:$0xff]  }
   0x2   :  { %235 = vmatprep.subr.bf16.mxu0 %v255_v0  ;;  %v258_v3 = vld [vmem:[%s324_s1 + $0x18] sm:$0xff]   ;;  %v263_v4 = vld [vmem:[%s325_s0] sm:$0xff]   ;;  %v260_v6 = vld [vmem:[%s324_s1 + $0x28] sm:$0xff]  }
   0x3   :  { %236 = vmatpush3.bf16.msra.mxu0 %v255_v0  ;;  %251 = vmatprep.mubr.bf16.mxu0 %v263_v4  ;;  %v259_v5 = vld [vmem:[%s324_s1 + $0x20] sm:$0xff]   ;;  %v261_v7 = vld [vmem:[%s324_s1 + $0x30] sm:$0xff]   ;;  %v262_v8 = vld [vmem:[%s324_s1 + $0x38] sm:$0xff]  }
   0x4   :  { %237 = vmatprep.subr.bf16.mxu0 %v256_v1  ;;  %v264_v9 = vld [vmem:[%s325_s0 + $0x8] sm:$0xff]  }
   0x7   :  { %238 = vmatpush3.bf16.msra.mxu0 %v256_v1 }
   0x8   :  { %239 = vmatprep.subr.bf16.mxu0 %v257_v2 }
   0xb   :  { %240 = vmatpush3.bf16.msra.mxu0 %v257_v2 }
   0xc   :  { %241 = vmatprep.subr.bf16.mxu0 %v258_v3 }
   0xf   :  { %242 = vmatpush3.bf16.msra.mxu0 %v258_v3 }
  0x10   :  { %243 = vmatprep.subr.bf16.mxu0 %v259_v5 }
  0x13   :  { %244 = vmatpush3.bf16.msra.mxu0 %v259_v5 }
  0x14   :  { %245 = vmatprep.subr.bf16.mxu0 %v260_v6 }
  0x17   :  { %246 = vmatpush3.bf16.msra.mxu0 %v260_v6 }
  0x18   :  { %247 = vmatprep.subr.bf16.mxu0 %v261_v7 }
  0x1b   :  { %248 = vmatpush3.bf16.msra.mxu0 %v261_v7 }
  0x1c   :  { %249 = vmatprep.subr.bf16.mxu0 %v262_v8 }
  0x1f   :  { %250 = vmatpush3.bf16.msra.mxu0 %v262_v8 }
  0x22   :  { %252 = vmatmul.mubr.bf16.vlgmr.msra.gmra.mrb[0].mxu0 %v264_v9 }
  0xf5   :  { %v253_v10 = vpop.f32.mrb[0].mxu0 }
  0xf6   :  { %v128_v11 = vpop.f32.mrb[1].mxu0  ;;  %v174_v19 = vmul.f32 %v253_v10, %v253_v10 }
  0xf7   :  { %v254_v12 = vpop.f32.mrb[2].mxu0  ;;  %v172_v15 = vmul.f32 %v128_v11, %v128_v11 }
  0xf8   :  { %v222_v13 = vpack.c.bf16 %v254_v12, %v253_v10  ;;  %v131_v14 = vpop.f32.mrb[3].mxu0  ;;  %v175_v22 = vmul.f32 %v254_v12, %v254_v12 }
  0xf9   :  { %v217_v16 = vpack.c.bf16 %v131_v14, %v128_v11  ;;  %v163_v17 = vadd.f32 %v131_v14, %v128_v11  ;;  %v173_v18 = vmul.f32 %v131_v14, %v131_v14 }
  0xfa   :  { %224 = vst [vmem:[%s326_s2 + $0x8] sm:$0xff] %v222_v13  }
  0xfb   :  { %218 = vst [vmem:[%s326_s2] sm:$0xff] %v217_v16   ;;  %v164_v20 = vadd.f32 %v253_v10, %v163_v17  ;;  %v176_v21 = vadd.f32 %v173_v18, %v172_v15 }
  0xfd   :  { %v165_v23 = vadd.f32 %v254_v12, %v164_v20  ;;  %v177_v24 = vadd.f32 %v176_v21, %v174_v19 }
  0xff   :  { %v166_v25 = vrot.slane %v165_v23, 4  ;;  %v178_v26 = vadd.f32 %v177_v24, %v175_v22 }
 0x101   :  { %v167_v27 = vadd.f32 %v166_v25, %v165_v23  ;;  %v179_v28 = vrot.slane %v178_v26, 4 }
 0x103   :  { %v168_v29 = vrot.slane %v167_v27, 2  ;;  %v180_v30 = vadd.f32 %v179_v28, %v178_v26 }
 0x105   :  { %v169_v31 = vadd.f32 %v168_v29, %v167_v27  ;;  %v181_v32 = vrot.slane %v180_v30, 2 }
 0x107   :  { %v170_v33 = vrot.slane %v169_v31, 1  ;;  %v182_v34 = vadd.f32 %v181_v32, %v180_v30 }
 0x109   :  { %v183_v35 = vrot.slane %v182_v34, 1  ;;  %v171_v36 = vadd.f32 %v170_v33, %v169_v31 }
 0x10b   :  { %v184_v37 = vadd.f32 %v183_v35, %v182_v34 }
 0x10d   :  { %v186_v38 = vsel %vm185_vm0, %v171_v36, %v184_v37 }
 0x10e   :  { %187 = vst [vmem:[%s327_s3] sm:$0x3] %v186_v38 }

// kernel: encoder_forward.9
= control target key start
LH: loop header
LB: loop body
LE: loop exit
PB: predicated region body
PF: predicated region fallthrough
CT: control target
= control target key end

     0   :  { %12 = vsyncpa [#allocation3], 0  ;;  %v57_v9 = vlaneseq  ;;  %v500_v10 = vmov 1966171168   ;;  %s687_s0 = inlined_call_operand.vmem [shape: bf16[2,256], index: 0, kind: input, shape index: {}]   ;;  %s688_s1 = inlined_call_operand.vmem [shape: bf16[256,256], index: 1, kind: input, shape index: {}]   ;;  %s689_s2 = inlined_call_operand.vmem [shape: f32[1,256], index: 2, kind: input, shape index: {}]   ;;  %s690_s3 = inlined_call_operand.vmem [shape: f32[2,128], index: 3, kind: input, shape index: {}]   ;;  %s691_s4 = inlined_call_operand.hbm [shape: f32[2,128], index: 4, kind: output, shape index: {0}]   ;;  %s692_s5 = inlined_call_operand.hbm [shape: f32[2,128], index: 5, kind: output, shape index: {1}]   ;;  %s693_s6 = inlined_call_operand.hbm [shape: f32[2,128], index: 6, kind: output, shape index: {2}]  }
   0x1   :  { %v380_v0 = vld [vmem:[%s688_s1 + $0x4] ss:$8 sps:$4 sm:$0xff]   ;;  %v382_v1 = vld [vmem:[%s688_s1] ss:$8 sps:$4 sm:$0xff]   ;;  %v383_v2 = vld [vmem:[%s688_s1 + $0x14] ss:$8 sps:$4 sm:$0xff]   ;;  %v77_v11 = vunpack.c.l.s4 %v500_v10 }
   0x2   :  { %252 = vmatprep.subr.bf16.mxu0 %v380_v0  ;;  %v385_v3 = vld [vmem:[%s688_s1 + $0x10] ss:$8 sps:$4 sm:$0xff]   ;;  %v386_v4 = vld [vmem:[%s688_s1 + $0x24] ss:$8 sps:$4 sm:$0xff]   ;;  %v388_v5 = vld [vmem:[%s688_s1 + $0x20] ss:$8 sps:$4 sm:$0xff]  }
   0x3   :  { %253 = vmatpush1.bf16.msra.mxu0 %v382_v1  ;;  %v389_v6 = vld [vmem:[%s688_s1 + $0x34] ss:$8 sps:$4 sm:$0xff]   ;;  %v391_v7 = vld [vmem:[%s688_s1 + $0x30] ss:$8 sps:$4 sm:$0xff]   ;;  %v392_v8 = vld [vmem:[%s688_s1 + $0x44] ss:$8 sps:$4 sm:$0xff]   ;;  %v78_v15 = vunpack.c.0.s8 %v77_v11 }
   0x4   :  { %254 = vmatprep.subr.bf16.mxu0 %v383_v2  ;;  %v394_v12 = vld [vmem:[%s688_s1 + $0x40] ss:$8 sps:$4 sm:$0xff]   ;;  %v395_v13 = vld [vmem:[%s688_s1 + $0x54] ss:$8 sps:$4 sm:$0xff]   ;;  %v58_v14 = vshrl.u32 %v57_v9, 7 }
   0x5   :  { %v397_v16 = vld [vmem:[%s688_s1 + $0x50] ss:$8 sps:$4 sm:$0xff]   ;;  %v398_v17 = vld [vmem:[%s688_s1 + $0x64] ss:$8 sps:$4 sm:$0xff]  }
   0x6   :  { %v81_v18 = vsub.s32 %v78_v15, %v58_v14  ;;  %v343_v19 = vld.sshfl [vmem:[%s687_s0] sm:$0x11 pattern:$0x75316420] }
   0x7   :  { %255 = vmatpush1.bf16.msra.mxu0 %v385_v3  ;;  %v75_v20 = vcombine.high %v343_v19, %v343_v19 }
   0x8   :  { %256 = vmatprep.subr.bf16.mxu0 %v386_v4 }
   0xb   :  { %257 = vmatpush1.bf16.msra.mxu0 %v388_v5 }
   0xc   :  { %258 = vmatprep.subr.bf16.mxu0 %v389_v6 }
   0xf   :  { %259 = vmatpush1.bf16.msra.mxu0 %v391_v7 }
  0x10   :  { %260 = vmatprep.subr.bf16.mxu0 %v392_v8 }
  0x13   :  { %261 = vmatpush1.bf16.msra.mxu0 %v394_v12 }
  0x14   :  { %262 = vmatprep.subr.bf16.mxu0 %v395_v13 }
  0x15   :  { %13 = vsyncpa [#allocation5], 0  ;;  %v400_v21 = vld [vmem:[%s688_s1 + $0x60] ss:$8 sps:$4 sm:$0xff]   ;;  %v401_v22 = vld [vmem:[%s688_s1 + $0x74] ss:$8 sps:$4 sm:$0xff]   ;;  %v89_v23 = vrot.slane %v75_v20, %v81_v18  ;;  %v82_v41 = vrot.slane %v343_v19, %v81_v18 }
  0x16   :  { %v403_v24 = vld [vmem:[%s688_s1 + $0x70] ss:$8 sps:$4 sm:$0xff]   ;;  %v404_v25 = vld [vmem:[%s688_s1 + $0x84] ss:$8 sps:$4 sm:$0xff]   ;;  %v406_v26 = vld [vmem:[%s688_s1 + $0x80] ss:$8 sps:$4 sm:$0xff]  }
  0x17   :  { %263 = vmatpush1.bf16.msra.mxu0 %v397_v16  ;;  %284 = vmatprep.mubr.bf16.mxu0 %v89_v23  ;;  %v407_v27 = vld [vmem:[%s688_s1 + $0x94] ss:$8 sps:$4 sm:$0xff]   ;;  %v409_v28 = vld [vmem:[%s688_s1 + $0x90] ss:$8 sps:$4 sm:$0xff]   ;;  %v410_v29 = vld [vmem:[%s688_s1 + $0xa4] ss:$8 sps:$4 sm:$0xff]  }
  0x18   :  { %264 = vmatprep.subr.bf16.mxu0 %v398_v17  ;;  %v412_v30 = vld [vmem:[%s688_s1 + $0xa0] ss:$8 sps:$4 sm:$0xff]   ;;  %v413_v31 = vld [vmem:[%s688_s1 + $0xb4] ss:$8 sps:$4 sm:$0xff]   ;;  %v415_v32 = vld [vmem:[%s688_s1 + $0xb0] ss:$8 sps:$4 sm:$0xff]  }
  0x19   :  { %v416_v33 = vld [vmem:[%s688_s1 + $0xc4] ss:$8 sps:$4 sm:$0xff]   ;;  %v418_v34 = vld [vmem:[%s688_s1 + $0xc0] ss:$8 sps:$4 sm:$0xff]   ;;  %v419_v35 = vld [vmem:[%s688_s1 + $0xd4] ss:$8 sps:$4 sm:$0xff]  }
  0x1a   :  { %v421_v36 = vld [vmem:[%s688_s1 + $0xd0] ss:$8 sps:$4 sm:$0xff]   ;;  %v422_v37 = vld [vmem:[%s688_s1 + $0xe4] ss:$8 sps:$4 sm:$0xff]   ;;  %v424_v38 = vld [vmem:[%s688_s1 + $0xe0] ss:$8 sps:$4 sm:$0xff]  }
  0x1b   :  { %265 = vmatpush1.bf16.msra.mxu0 %v400_v21  ;;  %v425_v39 = vld [vmem:[%s688_s1 + $0xf4] ss:$8 sps:$4 sm:$0xff]   ;;  %v427_v40 = vld [vmem:[%s688_s1 + $0xf0] ss:$8 sps:$4 sm:$0xff]   ;;  %v59_v42 = vsub.s32 0, %v58_v14  ;;  %v63_v44 = vsub.s32 1, %v58_v14 }
  0x1c   :  { %266 = vmatprep.subr.bf16.mxu0 %v401_v22  ;;  %v55_v43 = vld [vmem:[%s689_s2] sm:$0x3]  ;;  %s501_s15 = smov [#allocation4]   ;;  %s502_s17 = smov [#allocation6]  }
  0x1d   :  { %v60_v45 = vrot.slane %v55_v43, %v59_v42  ;;  %v64_v46 = vrot.slane %v55_v43, %v63_v44  ;;  %s318_s16 = sshll.u32 %s501_s15, 4  ;;  %s328_s18 = sshll.u32 %s502_s17, 4  ;;  %s319_s16 = int_to_ptr.vmem [resolvable:$true] %s318_s16  ;;  %s641_s18 = int_to_ptr.vmem [resolvable:$true] %s328_s18 }
  0x1e   :  { %s430_s1 = scalar_lea.vmem %s319_s16, 32  ;;  %p435_p1 = scmp.lt.s32.totalorder %s319_s16, %s319_s16 }
  0x1f   :  { %267 = vmatpush1.bf16.msra.mxu0 %v403_v24  ;;  %p431_p0 = scmp.ne.s32.totalorder %s319_s16, %s430_s1  ;;  %p436_p2 = scmp.lt.s32.totalorder %s430_s1, %s430_s1 }
  0x20   :  { %268 = vmatprep.subr.bf16.mxu0 %v404_v25 }
  0x21   :  { %p437_p3 = por %p436_p2, %p435_p1 }
  0x23   :  { %269 = vmatpush1.bf16.msra.mxu0 %v406_v26  ;;  %p438_p4 = pnand %p437_p3, %p431_p0 }
  0x24   :  { %270 = vmatprep.subr.bf16.mxu0 %v407_v27 }
  0x27   :  { %271 = vmatpush1.bf16.msra.mxu0 %v409_v28 }
  0x28   :  { %272 = vmatprep.subr.bf16.mxu0 %v410_v29 }
  0x2b   :  { %273 = vmatpush1.bf16.msra.mxu0 %v412_v30 }
  0x2c   :  { %274 = vmatprep.subr.bf16.mxu0 %v413_v31 }
  0x2f   :  { %275 = vmatpush1.bf16.msra.mxu0 %v415_v32 }
  0x30   :  { %276 = vmatprep.subr.bf16.mxu0 %v416_v33 }
  0x33   :  { %277 = vmatpush1.bf16.msra.mxu0 %v418_v34 }
  0x34   :  { %278 = vmatprep.subr.bf16.mxu0 %v419_v35 }
  0x37   :  { %279 = vmatpush1.bf16.msra.mxu0 %v421_v36 }
  0x38   :  { %280 = vmatprep.subr.bf16.mxu0 %v422_v37 }
  0x3b   :  { %281 = vmatpush1.bf16.msra.mxu0 %v424_v38 }
  0x3c   :  { %282 = vmatprep.subr.bf16.mxu0 %v425_v39 }
  0x3f   :  { %283 = vmatpush1.bf16.msra.mxu0 %v427_v40 }
  0x42   :  { %285 = vmatmul.mubr.bf16.vlgmr.msra.gmra.mrb[0].mxu0 %v82_v41 }
 0x115   :  { %v286_v47 = vpop.f32.mrb[0].mxu0 }
 0x116   :  { %v287_v48 = vadd.f32 %v286_v47, %v60_v45  ;;  %v288_v49 = vpop.f32.mrb[1].mxu0 }
 0x117   :  { %v289_v50 = vadd.f32 %v288_v49, %v64_v46  ;;  %v290_v51 = vpop.f32.mrb[2].mxu0 }
 0x118   :  { %300 = vst [vmem:[#allocation4] sm:$0x3] %v287_v48  ;;  %v291_v52 = vpop.f32.mrb[3].mxu0 }
 0x119   :  { %v293_v53 = vmul.f32 0.5, %v289_v50  ;;  %301 = vst [vmem:[#allocation6] sm:$0x3] %v289_v50 }
 0x11a   :  { %441 = shalt.err (!%p438_p4)
}
 0x11b   :  { %s442_s20 = scalar_lea.hbm %s692_s5, 32 }
 0x11c   :  { %p443_p5 = scmp.ne.s32.totalorder %s692_s5, %s442_s20  ;;  %p446_p6 = scmp.lt.u32.totalorder %s442_s20, %s692_s5 }
 0x11e   :  { %p448_p7 = pnand %p446_p6, %p443_p5 }
 0x120   :  { %451 = shalt.err (!%p448_p7)
}
 0x121   :  { %321 = dma.vmem_to_hbm [thread:$0]  %s319_s16, 32, %s692_s5, [#allocation5]  }
 0x122   :  { %s452_s27 = scalar_lea.vmem %s641_s18, 32  ;;  %p457_p9 = scmp.lt.s32.totalorder %s641_s18, %s641_s18 }
 0x123   :  { %p453_p8 = scmp.ne.s32.totalorder %s641_s18, %s452_s27  ;;  %p458_p10 = scmp.lt.s32.totalorder %s452_s27, %s452_s27 }
 0x125   :  { %p459_p11 = por %p458_p10, %p457_p9 }
 0x127   :  { %p460_p12 = pnand %p459_p11, %p453_p8 }
 0x129   :  { %463 = shalt.err (!%p460_p12)
}
 0x12a   :  { %s464_s30 = scalar_lea.hbm %s693_s6, 32 }
 0x12b   :  { %p465_p13 = scmp.ne.s32.totalorder %s693_s6, %s464_s30  ;;  %p468_p0 = scmp.lt.u32.totalorder %s464_s30, %s693_s6 }
 0x12d   :  { %p470_p1 = pnand %p468_p0, %p465_p13 }
 0x12f   :  { %473 = shalt.err (!%p470_p1)
}
 0x130   :  { %331 = dma.vmem_to_hbm [thread:$0]  %s641_s18, 32, %s693_s6, [#allocation5]   ;;  %v294_v54 = vmul.f32 1.442695, %v293_v53  ;;  %v296_v55 = vld [vmem:[%s690_s3] sm:$0x3] }
 0x131   :  { %s503_s13 = smov [#allocation2]  }
 0x132   :  { %428 = vpow2.f32 %v294_v54  ;;  %s308_s14 = sshll.u32 %s503_s13, 4  ;;  %s309_s14 = int_to_ptr.vmem [resolvable:$true] %s308_s14 }
 0x133   :  { %s474_s15 = scalar_lea.vmem %s309_s14, 32  ;;  %p479_p3 = scmp.lt.s32.totalorder %s309_s14, %s309_s14 }
 0x134   :  { %p475_p2 = scmp.ne.s32.totalorder %s309_s14, %s474_s15  ;;  %p480_p4 = scmp.lt.s32.totalorder %s474_s15, %s474_s15 }
 0x136   :  { %p481_p5 = por %p480_p4, %p479_p3 }
 0x138   :  { %p482_p6 = pnand %p481_p5, %p475_p2 }
 0x13c   :  { %v429_v56 = vpop.eup %428 }
 0x13d   :  { %v297_v57 = vmul.f32 %v429_v56, %v296_v55 }
 0x13f   :  { %v298_v58 = vadd.f32 %v297_v57, %v287_v48 }
 0x141   :  { %299 = vst [vmem:[#allocation2] sm:$0x3] %v298_v58 }
 0x142   :  { %485 = shalt.err (!%p482_p6)
}
 0x143   :  { %s486_s17 = scalar_lea.hbm %s691_s4, 32 }
 0x144   :  { %p487_p7 = scmp.ne.s32.totalorder %s691_s4, %s486_s17  ;;  %p490_p8 = scmp.lt.u32.totalorder %s486_s17, %s691_s4 }
 0x146   :  { %p492_p9 = pnand %p490_p8, %p487_p7 }
 0x148   :  { %495 = shalt.err (!%p492_p9)
}
 0x149   :  { %311 = dma.vmem_to_hbm [thread:$0]  %s309_s14, 32, %s691_s4, [#allocation3]  }
 0x14a   :  { %496 = dma.done.wait [#allocation3], 32  }
 0x14b   :  { %497 = vsyncadd [#allocation3], 4294967264 }
 0x14c   :  { %498 = dma.done.wait [#allocation5], 64  }
 0x14d   :  { %499 = vsyncadd [#allocation5], 4294967232 }
 0x14e   :  { %341 = vsyncpa [#allocation3], 1 }
 0x14f   :  { %342 = vsyncpa [#allocation5], 1 }

</bundles_post_ra>
